<compile_context>
chip_gen: v5e
topology: v5e:2x2
jax: 0.10.0
libtpu: 0.0.40
codegen_flags: <defaults>
</compile_context>

<pallas_src>
import functools

import jax
import jax.numpy as jnp
from jax.experimental import pallas as pl
from jax.experimental.pallas import tpu as pltpu


def _fmu_me_gemm_kernel(j_ref, z_ref, dxy_ref):
    # One fused MXU GEMM per batch tile:  dxy[:, tile] = J @ z[:, tile]
    dxy_ref[...] = jnp.dot(
        j_ref[...], z_ref[...], preferred_element_type=jnp.float32
    ).astype(dxy_ref.dtype)


def build_fmu_jacobian(J_x, J_u, dtype=jnp.float32):
    """Fuse [J_x | J_u] -> [M, NX+NU] once (Jacobians are reused across steps).

    Do this when the Jacobians are materialized from the FMU, not per forward
    call, so the cast/concat never sits on the hot integration loop.
    """
    return jnp.concatenate([J_x.astype(dtype), J_u.astype(dtype)], axis=1)


@functools.partial(jax.jit, static_argnames=("nx", "batch_tile"))
def fmu_me_forward_batched(X, U, J, *, nx, batch_tile=128):
    """Batched Pallas equivalent of FmuMEModule.forward.

    X: [NX, B]  continuous states, batch on the lane axis
    U: [NU, B]  inputs,            batch on the lane axis
    J: [M, NX+NU] fused FMU Jacobian [J_dxy_x | J_dxy_u] (f32, precomputed)

    Returns (dX: [NX, B], Y: [M-NX, B]).
    """
    M, NXU = J.shape
    NX, B = X.shape
    NU, _ = U.shape
    assert NX == nx and NX + NU == NXU

    # z = [x; u] stacked once per call (cheap; states/inputs change every step).
    Z = jnp.concatenate([X, U], axis=0).astype(J.dtype)        # [NXU, B]

    # Pad batch to a lane-dense multiple of the tile width.
    B_pad = pl.cdiv(B, batch_tile) * batch_tile
    if B_pad != B:
        Z = jnp.pad(Z, ((0, 0), (0, B_pad - B)))

    dxy = pl.pallas_call(
        _fmu_me_gemm_kernel,
        out_shape=jax.ShapeDtypeStruct((M, B_pad), jnp.float32),
        grid=(B_pad // batch_tile,),
        in_specs=[
            # J: full-array block, same block index every step -> stays resident.
            pl.BlockSpec((M, NXU), lambda i: (0, 0)),
            # Z: one 128-wide batch tile per grid step (lane-dense).
            pl.BlockSpec((NXU, batch_tile), lambda i: (0, i)),
        ],
        out_specs=pl.BlockSpec((M, batch_tile), lambda i: (0, i)),
        compiler_params=pltpu.CompilerParams(
            # Batch tiles are independent -> v7x can shard them over its 2 TCs.
            dimension_semantics=("parallel",),
        ),
    )(J, Z)

    dxy = dxy[:, :B]
    return dxy[:nx, :], dxy[nx:, :]


def fmu_me_forward(u, x, J, *, nx, batch_tile=128):
    """Single-pair forward (same call signature semantics as the nn.Module):
    u: [NU], x: [NX]  ->  (dx: [NX], y: [NY]).

    Implemented by padding the single column into one lane-dense batch tile;
    for a truly single-vector hot loop, prefer batching integration steps /
    FMU instances into fmu_me_forward_batched.
    """
    X = x.reshape(-1, 1)
    U = u.reshape(-1, 1)
    dX, Y = fmu_me_forward_batched(X, U, J, nx=nx, batch_tile=batch_tile)
    return dX[:, 0], Y[:, 0]


if __name__ == "__main__":
    # Synthetic "FMU": nx continuous states, nu inputs, ny outputs.
    nx, nu, ny = 32, 8, 8
    M = nx + ny
    B = 256  # batch of (x, u) evaluations -> two 128-wide lane-dense tiles

    key = jax.random.PRNGKey(0)
    k_jx, k_ju, k_x, k_u = jax.random.split(key, 4)

    # Stand-ins for fmu.getDirectionalDerivative results.
    J_x = jax.random.normal(k_jx, (M, nx), dtype=jnp.float32) * 0.1
    J_u = jax.random.normal(k_ju, (M, nu), dtype=jnp.float32) * 0.1
    J = build_fmu_jacobian(J_x, J_u)  # fused + cast once, device resident

    X = jax.random.normal(k_x, (nx, B), dtype=jnp.float32)
    U = jax.random.normal(k_u, (nu, B), dtype=jnp.float32)

    # Batched forward (the performance path).
    dX, Y = fmu_me_forward_batched(X, U, J, nx=nx)
    dX, Y = jax.block_until_ready((dX, Y))

    # Pure-JAX reference of the same state-space map.
    dxy_ref = J_x @ X + J_u @ U
    assert dX.shape == (nx, B) and Y.shape == (ny, B)
    assert jnp.allclose(dX, dxy_ref[:nx], atol=1e-4, rtol=1e-4)
    assert jnp.allclose(Y, dxy_ref[nx:], atol=1e-4, rtol=1e-4)

    # Single-(u, x) path, matching FmuMEModule.forward(u, x) -> (dx, y).
    u1, x1 = U[:, 0], X[:, 0]
    dx1, y1 = fmu_me_forward(u1, x1, J, nx=nx)
    dx1, y1 = jax.block_until_ready((dx1, y1))
    assert dx1.shape == (nx,) and y1.shape == (ny,)
    assert jnp.allclose(dx1, dxy_ref[:nx, 0], atol=1e-4, rtol=1e-4)
    assert jnp.allclose(y1, dxy_ref[nx:, 0], atol=1e-4, rtol=1e-4)

    print("KERNEL_OK")
</pallas_src>

<mosaic_0001>
module attributes {stable_mosaic.version = 11 : i64} {
  func.func @_fmu_me_gemm_kernel(%arg0: i32, %arg1: memref<40x40xf32, #tpu.memory_space<vmem>>, %arg2: memref<40x128xf32, #tpu.memory_space<vmem>>, %arg3: memref<40x128xf32, #tpu.memory_space<vmem>>) attributes {dimension_semantics = [#tpu.dimension_semantics<parallel>], iteration_bounds = array<i64: 2>, scalar_prefetch = 0 : i64, scratch_operands = 0 : i64, tpu.core_type = #tpu.core_type<tc>, window_params = [{pipeline_mode = #tpu.pipeline_mode<synchronous>, transform_indices = @transform_0, window_bounds = array<i64: 40, 40>}, {transform_indices = @transform_1, window_bounds = array<i64: 40, 128>}, {transform_indices = @transform_2, window_bounds = array<i64: 40, 128>}]} {
    %c0 = arith.constant 0 : index
    %c0_0 = arith.constant 0 : index
    %0 = vector.load %arg1[%c0, %c0_0] : memref<40x40xf32, #tpu.memory_space<vmem>>, vector<40x40xf32>
    %c0_1 = arith.constant 0 : index
    %c0_2 = arith.constant 0 : index
    %1 = vector.load %arg2[%c0_1, %c0_2] : memref<40x128xf32, #tpu.memory_space<vmem>>, vector<40x128xf32>
    %cst = arith.constant dense<0.000000e+00> : vector<40x128xf32>
    %2 = tpu.matmul %0, %1, %cst {dimension_numbers = #tpu.dot_dimension_numbers<[1], [0], [0], [1], [0, 0, 1, 1], [], []>} : vector<40x40xf32>, vector<40x128xf32>, vector<40x128xf32> -> vector<40x128xf32>
    %c0_3 = arith.constant 0 : index
    %c0_4 = arith.constant 0 : index
    %3 = vector.load %arg3[%c0_3, %c0_4] : memref<40x128xf32, #tpu.memory_space<vmem>>, vector<40x128xf32>
    tpu.vector_store %arg3[%c0_3, %c0_4], %2 {strides = array<i32>} : memref<40x128xf32, #tpu.memory_space<vmem>>, vector<40x128xf32>,
    return
  }
  func.func @transform_0(%arg0: i32) -> (i32, i32) {
    %c0_i32 = arith.constant 0 : i32
    %c0_i32_0 = arith.constant 0 : i32
    %c0_i32_1 = arith.constant 0 : i32
    return %c0_i32, %c0_i32_0 : i32, i32
  }
  func.func @transform_1(%arg0: i32) -> (i32, i32) {
    %c0_i32 = arith.constant 0 : i32
    %c0_i32_0 = arith.constant 0 : i32
    return %c0_i32, %arg0 : i32, i32
  }
  func.func @transform_2(%arg0: i32) -> (i32, i32) {
    %c0_i32 = arith.constant 0 : i32
    %c0_i32_0 = arith.constant 0 : i32
    return %c0_i32, %arg0 : i32, i32
  }
}

</mosaic_0001>

<bundles_post_ra>
// kernel: fmu_me_forward_batched.1
= control target key start
LH: loop header
LB: loop body
LE: loop exit
PB: predicated region body
PF: predicated region fallthrough
CT: control target
= control target key end

     0   :  { %s460_s9 = smov 0   ;;  %s462_s10 = smov 0   ;;  %s544_s0 = inlined_call_operand.vmem [shape: f32[40,40], index: 0, kind: input, shape index: {}]   ;;  %s545_s1 = inlined_call_operand.vmem [shape: f32[40,256], index: 1, kind: input, shape index: {}]   ;;  %s546_s2 = inlined_call_operand.vmem [shape: f32[40,256], index: 2, kind: output, shape index: {}]  }
   0x1   :  { %s464_s11 = smov 0  }
   0x2 LB: > { %s366_s12 = sadd.s32 4294967295, %s443_s11   ;;  %s477_s13 = sadd.s32 1, %s443_s11   ;;  %s443_s11 = sphi %s464_s11, %s550_s11   ;;  %s439_s10 = sphi %s462_s10, %s549_s10   ;;  %s435_s9 = sphi %s460_s9, %s548_s9  }
   0x3   : > { %s37_s14 = ssub.s32 %s443_s11, %s477_s13  ;;  %s40_s15 = sadd.s32 1, %s439_s10 }
   0x4   : > { %p38_p0 = scmp.eq.s32.totalorder %s37_s14, 0  ;;  %p47_p1 = scmp.ne.s32.totalorder %s439_s10, %s435_s9 }
   0x5   : > { %p48_p2 = scmp.eq.s32.totalorder %s443_s11, 0  ;;  %p77_p3 = scmp.eq.s32.totalorder %s366_s12, 1 }
   0x6   : > { %s488_s16 = scalar_select %p38_p0, %s439_s10, %s40_s15  }
   0x7   : > { %p49_p4 = por %p48_p2, %p47_p1  ;;  %p490_p5 = por %p77_p3, %p47_p1 }
   0x8   : > { %p369_p6 = scmp.ge.s32.totalorder %s443_s11, 2 }
   0xa   : > { %102 = sbr.rel (%p369_p6) target bundleno = 24 (0x18), region = 20 }
   0xf   : > { %105 = sbr.rel (!%p49_p4) target bundleno = 24 (0x18), region = 24  ;;  %s107_s18 = sand.u32 (%p49_p4), 1, %s439_s10  }
  0x10   : > { %s370_s19 = sshll.u32 (%p49_p4), %s443_s11, 3  ;;  %s395_s20 = smul.u32 (%p49_p4), 40, %s107_s18 }
  0x11   : > { %s111_s23 = scalar_lea.vmem (%p49_p4), %s545_s1, %s370_s19 }
  0x12   : > { %v148_v0 = vld [vmem:[%s111_s23] sm:$0xff] (%p49_p4)  ;;  %v150_v1 = vld [vmem:[%s111_s23 + $0x10] sm:$0xff] (%p49_p4)  ;;  %s109_s24 = scalar_lea.vmem (%p49_p4), [#allocation2], %s395_s20 }
  0x13   : > { %v152_v2 = vld [vmem:[%s111_s23 + $0x20] sm:$0xff] (%p49_p4)  ;;  %149 = vst [vmem:[%s109_s24] sm:$0xff] (%p49_p4), %v148_v0  ;;  %v154_v3 = vld [vmem:[%s111_s23 + $0x30] sm:$0xff] (%p49_p4) }
  0x14   : > { %151 = vst [vmem:[%s109_s24 + $0x8] sm:$0xff] %v150_v1  ;;  %v156_v4 = vld [vmem:[%s111_s23 + $0x40] sm:$0xff] }
  0x15   : > { %153 = vst [vmem:[%s109_s24 + $0x10] sm:$0xff] %v152_v2 }
  0x16   : > { %155 = vst [vmem:[%s109_s24 + $0x18] sm:$0xff] %v154_v3 }
  0x17   : > { %157 = vst [vmem:[%s109_s24 + $0x20] sm:$0xff] %v156_v4 }
  0x18 PF: > { %p371_p7 = scmp.ge.s32.totalorder %s443_s11, 1  ;;  %p162_p8 = scmp.lt.s32.totalorder %s443_s11, 3 }
  0x1a   : > { %p163_p9 = pnand %p371_p7, %p162_p8 }
  0x1b   : > { %s169_s25 = sand.u32 (!%p163_p9), 1, %s435_s9  }
  0x1c   : > { %166 = sbr.rel (%p163_p9) target bundleno = 192 (0xc0), region = 62 }
  0x1d   : > { %s503_s26 = smul.u32 (!%p163_p9), 40, %s169_s25 }
  0x1f   : > { %s171_s27 = scalar_lea.vmem (!%p163_p9), [#allocation2], %s503_s26  ;;  %s188_s14 = scalar_lea.vmem (!%p163_p9), [#allocation3], %s503_s26 }
  0x21   : > { %v198_v5 = vld [vmem:[%s171_s27 + $0x20] sm:$0xff]  ;;  %v197_v6 = vld [vmem:[%s171_s27 + $0x18] sm:$0xff]  ;;  %v196_v7 = vld [vmem:[%s171_s27 + $0x10] sm:$0xff]  ;;  %vm199_vm0 = vcmask 326656   ;;  %s377_s15 = sshll.u32 (%p490_p5), %s366_s12, 3 }
  0x22   : > { %382 = vmatpush.msra.mxu3 %v198_v5  ;;  %381 = vmatpush.msra.mxu2 %v198_v5  ;;  %v195_v8 = vld [vmem:[%s171_s27 + $0x8] sm:$0xff]  ;;  %v194_v9 = vld [vmem:[%s171_s27] sm:$0xff]  ;;  %v192_v10 = vld [vmem:[%s544_s0 + $0x18] sm:$0xff]  ;;  %s260_s20 = scalar_lea.vmem (%p490_p5), %s546_s2, %s377_s15 }
  0x23   : > { %226 = vmatpush.msra.mxu0 %v198_v5  ;;  %380 = vmatpush.msra.mxu1 %v198_v5  ;;  %v191_v11 = vld [vmem:[%s544_s0 + $0x10] sm:$0xff]  ;;  %v189_v12 = vld [vmem:[%s544_s0] sm:$0xff]  ;;  %v190_v13 = vld [vmem:[%s544_s0 + $0x8] sm:$0xff] }
  0x24   : > { %385 = vmatpush.msra.mxu3 %v197_v6  ;;  %384 = vmatpush.msra.mxu2 %v197_v6  ;;  %v193_v14 = vld [vmem:[%s544_s0 + $0x20] sm:$0xff] }
  0x25   : > { %227 = vmatpush.msra.mxu0 %v197_v6  ;;  %383 = vmatpush.msra.mxu1 %v197_v6 }
  0x26   : > { %388 = vmatpush.msra.mxu3 %v196_v7  ;;  %387 = vmatpush.msra.mxu2 %v196_v7 }
  0x27   : > { %228 = vmatpush.msra.mxu0 %v196_v7  ;;  %386 = vmatpush.msra.mxu1 %v196_v7 }
  0x28   : > { %391 = vmatpush.msra.mxu3 %v195_v8  ;;  %390 = vmatpush.msra.mxu2 %v195_v8 }
  0x29   : > { %229 = vmatpush.msra.mxu0 %v195_v8  ;;  %389 = vmatpush.msra.mxu1 %v195_v8 }
  0x2a   : > { %394 = vmatpush.msra.mxu3 %v194_v9  ;;  %393 = vmatpush.msra.mxu2 %v194_v9 }
  0x2b   : > { %375 = vmatmul.msk.f32.vlgmr.msra.gmra.mxu3 %vm199_vm0, %v192_v10  ;;  %374 = vmatmul.msk.f32.vlgmr.msra.gmra.mxu2 %vm199_vm0, %v191_v11 }
  0x2c   : > { %230 = vmatpush.msra.mxu0 %v194_v9  ;;  %392 = vmatpush.msra.mxu1 %v194_v9 }
  0x2d   : > { %372 = vmatmul.msk.f32.vlgmr.msra.gmra.mxu0 %vm199_vm0, %v189_v12  ;;  %373 = vmatmul.msk.f32.vlgmr.msra.gmra.mxu1 %vm199_vm0, %v190_v13 }
  0x33   : > { %376 = vmatmul.msk.f32.gmra.mxu3 %vm199_vm0, %v193_v14 }
  0xaa   : > { %v232_v15 = vpop.f32.mrf.mxu0  ;;  %v235_v16 = vpop.f32.mrf.mxu1 }
  0xab   : > { %247 = vst [vmem:[%s188_s14] sm:$0xff] %v232_v15 }
  0xac   : > { %248 = vst [vmem:[%s188_s14 + $0x8] sm:$0xff] %v235_v16 }
  0xae   : > { %v241_v17 = vpop.f32.mrf.mxu3  ;;  %v238_v18 = vpop.f32.mrf.mxu2 }
  0xaf   : > { %250 = vst [vmem:[%s188_s14 + $0x18] sm:$0xff] %v241_v17 }
  0xb0   : > { %249 = vst [vmem:[%s188_s14 + $0x10] sm:$0xff] %v238_v18 }
  0xb2   : > { %v297_v20 = vld [vmem:[%s188_s14] sm:$0xff] (%p490_p5) }
  0xb3   : > { %258 = sbr.rel (!%p490_p5) target bundleno = 192 (0xc0), region = 70  ;;  %v299_v21 = vld [vmem:[%s188_s14 + $0x8] sm:$0xff] (%p490_p5)  ;;  %298 = vst [vmem:[%s260_s20] sm:$0xff] (%p490_p5), %v297_v20 }
  0xb4   : > { %300 = vst [vmem:[%s260_s20 + $0x10] sm:$0xff] (%p490_p5), %v299_v21 }
  0xb6   : > { %v244_v19 = vpop.f32.mrf.mxu3  ;;  %v303_v23 = vld [vmem:[%s188_s14 + $0x18] sm:$0xff] (%p490_p5) }
  0xb7   : > { %251 = vst [vmem:[%s188_s14 + $0x20] sm:$0xff] %v244_v19  ;;  %v301_v22 = vld [vmem:[%s188_s14 + $0x10] sm:$0xff] (%p490_p5) }
  0xb8   : > { %302 = vst [vmem:[%s260_s20 + $0x20] sm:$0xff] %v301_v22 }
  0xb9   : > { %304 = vst [vmem:[%s260_s20 + $0x30] sm:$0xff] %v303_v23 }
  0xbe   : > { %v305_v24 = vld [vmem:[%s188_s14 + $0x20] sm:$0xff] }
  0xbf   : > { %306 = vst [vmem:[%s260_s20 + $0x40] sm:$0xff] %v305_v24 }
  0xc0 PF: > { %p9_p10 = scmp.ge.s32.totalorder %s477_s13, 4   ;;  %s548_s9 = smov %s439_s10 }
  0xc1   : > { %s549_s10 = smov %s488_s16  ;;  %s550_s11 = smov %s477_s13 }
  0xc2   :  { %11 = sbr.rel (!%p9_p10) target bundleno = 2 (0x2), region = 139 }

</bundles_post_ra>
